<compile_context>
chip_gen: v7x
topology: tpu7x:2x2x1
jax: 0.10.0
libtpu: 0.0.40
codegen_flags: <defaults>
</compile_context>

<pallas_src>
import functools

import jax
import jax.numpy as jnp
from jax.experimental import pallas as pl
from jax.experimental.pallas import tpu as pltpu


def _round_up(x, m):
    return (x + m - 1) // m * m


_VMEM_CAP = 48 * 1024 * 1024  # stay safely under v7x's 64 MiB physical VMEM/TC


def _vmem_limit(nbytes):
    assert nbytes < _VMEM_CAP, f"kernel working set {nbytes} B exceeds VMEM budget"
    return int(min(_VMEM_CAP, max(16 * 1024 * 1024, 2 * nbytes)))


# -----------------------------------------------------------------------------
# Kernel 1: fused [input projection] -> [LSTM recurrence] -> h_all (no grid).
# -----------------------------------------------------------------------------
def _lstm_recurrence_kernel(x_ref, wih_ref, b_ref, whh_ref, hall_ref, gx_ref,
                            *, seq_t, rows_b, hw):
    T, B, HW = seq_t, rows_b, hw
    G = 4 * HW

    # Phase 1: input projection for ALL time steps as one bf16 MXU matmul
    # (f32 accumulation, f32 bias add), hoisted out of the recurrence.
    gx_ref[...] = (jnp.dot(x_ref[...], wih_ref[...],
                           preferred_element_type=jnp.float32) + b_ref[...])

    compact_eup = HW < 128
    if compact_eup:
        # All four gate blocks share a small number of lane tiles: select the
        # nonlinearity per-lane so we pay one tanh + one sigmoid EUP pass over
        # the whole gates vreg instead of four per-gate passes.
        lane = jax.lax.broadcasted_iota(jnp.int32, (B, G), 1)
        is_g = jnp.logical_and(lane >= 2 * HW, lane < 3 * HW)

    def step(t, carry):
        h, c = carry                                       # f32 state, (B, HW)
        off = pl.multiple_of(t * B, B)                     # B % 8 == 0 -> aligned
        # Re-read W_hh from VMEM each step (cheap vld, hidden under the MXU
        # push) instead of keeping a large loop-invariant value live -> no
        # spill traffic on the serial critical path.
        gates = (gx_ref[pl.ds(off, B), :]
                 + jnp.dot(h.astype(jnp.bfloat16), whh_ref[...],
                           preferred_element_type=jnp.float32))      # (B, G) f32

        # PyTorch gate order: input, forget, cell(g), output.
        if compact_eup:
            act = jnp.where(is_g, jnp.tanh(gates), jax.nn.sigmoid(gates))
            i = act[:, 0 * HW:1 * HW]
            f = act[:, 1 * HW:2 * HW]
            g = act[:, 2 * HW:3 * HW]
            o = act[:, 3 * HW:4 * HW]
        else:
            # HW is a multiple of 128 -> gate slices are lane-tile aligned.
            i = jax.nn.sigmoid(gates[:, 0 * HW:1 * HW])
            f = jax.nn.sigmoid(gates[:, 1 * HW:2 * HW])
            g = jnp.tanh(gates[:, 2 * HW:3 * HW])
            o = jax.nn.sigmoid(gates[:, 3 * HW:4 * HW])

        c = f * c + i * g
        h = o * jnp.tanh(c)
        hall_ref[pl.ds(off, B), :] = h
        return (h, c)

    h0 = jnp.zeros((B, HW), jnp.float32)
    c0 = jnp.zeros((B, HW), jnp.float32)
    # Partial unroll keeps the LLO scheduler's cross-step overlap without
    # blowing up code size / vreg live ranges for large T.
    jax.lax.fori_loop(0, T, step, (h0, c0), unroll=min(T, 8))


# -----------------------------------------------------------------------------
# Kernel 2: output Linear, gridded over vocab tiles (pipelined, "parallel").
# -----------------------------------------------------------------------------
def _output_proj_kernel(h_ref, w_ref, b_ref, o_ref):
    # h_all is produced in f32 (keeps dynamic sublane stores simple in kernel 1);
    # cast to bf16 here so the MXU runs a native bf16 matmul with f32 acc.
    o_ref[...] = (jnp.dot(h_ref[...].astype(jnp.bfloat16), w_ref[...],
                          preferred_element_type=jnp.float32) + b_ref[...])


# -----------------------------------------------------------------------------
# Wrapper
# -----------------------------------------------------------------------------
def lstm_linear_pallas(x, w_ih_p, w_hh_p, b_p, w_out_p, b_out_p):
    """x: (T, B, E) f32; weights pre-padded/bf16.  Returns (T, Bp, Vp) f32."""
    T, B, E = x.shape
    Ec, G = w_ih_p.shape
    HW = G // 4
    Vp = w_out_p.shape[1]

    Bp = _round_up(B, 8)
    rows = T * Bp

    # Only the data-dependent x pad/cast stays in the forward (weights are
    # padded once at init time).  Zero padding is exact: padded rows/columns
    # never leak into the real outputs.
    xp = jnp.zeros((T, Bp, Ec), jnp.bfloat16).at[:, :B, :E].set(
        x.astype(jnp.bfloat16)).reshape(rows, Ec)

    # ---- kernel 1: input projection + serial LSTM recurrence ----------------
    bytes_k1 = (rows * Ec * 2 + Ec * G * 2 + G * 4 + HW * G * 2   # inputs
                + rows * HW * 4                                   # h_all out
                + rows * G * 4)                                   # gx scratch
    h_all = pl.pallas_call(
        functools.partial(_lstm_recurrence_kernel, seq_t=T, rows_b=Bp, hw=HW),
        out_shape=jax.ShapeDtypeStruct((rows, HW), jnp.float32),
        in_specs=[pl.BlockSpec(memory_space=pltpu.MemorySpace.VMEM)] * 4,
        out_specs=pl.BlockSpec(memory_space=pltpu.MemorySpace.VMEM),
        scratch_shapes=[pltpu.VMEM((rows, G), jnp.float32)],       # gates_x
        compiler_params=pltpu.CompilerParams(
            vmem_limit_bytes=_vmem_limit(bytes_k1)),
        cost_estimate=pl.CostEstimate(
            flops=2 * rows * Ec * G + 2 * rows * HW * G,
            transcendentals=5 * rows * HW,
            bytes_accessed=bytes_k1),
    )(xp, w_ih_p, b_p, w_hh_p)

    # ---- kernel 2: output projection, tiled over vocab ----------------------
    tn = 512 if Vp % 512 == 0 else (256 if Vp % 256 == 0 else 128)
    # Per-iteration footprint (double-buffered blocks).
    # TODO(synk): also tile the row axis for very large T*B.
    vmem_iter = 2 * (rows * HW * 4 + HW * tn * 2 + tn * 4 + rows * tn * 4)
    bytes_k2 = rows * HW * 4 + HW * Vp * 2 + Vp * 4 + rows * Vp * 4

    out2d = pl.pallas_call(
        _output_proj_kernel,
        out_shape=jax.ShapeDtypeStruct((rows, Vp), jnp.float32),
        grid=(Vp // tn,),
        in_specs=[
            pl.BlockSpec((rows, HW), lambda j: (0, 0)),   # h_all stays resident
            pl.BlockSpec((HW, tn), lambda j: (0, j)),     # W_out tiles, pipelined
            pl.BlockSpec((1, tn), lambda j: (0, j)),
        ],
        out_specs=pl.BlockSpec((rows, tn), lambda j: (0, j)),
        compiler_params=pltpu.CompilerParams(
            dimension_semantics=("parallel",),            # megacore on v7x
            vmem_limit_bytes=_vmem_limit(vmem_iter)),
        cost_estimate=pl.CostEstimate(
            flops=2 * rows * HW * Vp,
            transcendentals=0,
            bytes_accessed=bytes_k2),
    )(h_all, w_out_p, b_out_p)

    return out2d.reshape(T, Bp, Vp)


# -----------------------------------------------------------------------------
# DecoderRNN forward (embedding gather / concat are plain-JAX glue).
# -----------------------------------------------------------------------------
@jax.jit
def decoder_rnn_forward(params, features, captions):
    V, E = params["embedding"].shape

    # embeds = word_embedding(captions[:, :-1])
    embeds = jnp.take(params["embedding"], captions[:, :-1], axis=0)  # (batch, seq-1, E)

    # concat_embeds = cat(features.view(-1, 1, E), embeds, dim=1)
    concat = jnp.concatenate([features.reshape(-1, 1, E), embeds], axis=1)  # (batch, seq, E)

    # dropout(p=0.3): identity in eval mode.
    # TODO(synk): training-mode dropout masking is not implemented.

    batch, seq = concat.shape[0], concat.shape[1]
    # nn.LSTM default batch_first=False -> axis 0 is time; the module feeds
    # (batch, seq, E), so batch acts as time.  Kept as-is (faithful).
    out_p = lstm_linear_pallas(
        concat.astype(jnp.float32),
        params["w_ih_p"], params["w_hh_p"], params["b_p"],
        params["w_out_p"], params["b_out_p"])
    return out_p[:, :seq, :V]                                         # (batch, seq, vocab)


# -----------------------------------------------------------------------------
# Pure-JAX reference (for validation) — uses the raw f32 weights.
# -----------------------------------------------------------------------------
def _ref_lstm_linear(x, w_ih_t, w_hh_t, b, w_out_t, b_out):
    H = w_hh_t.shape[0]

    def step(carry, xt):
        h, c = carry
        gates = xt @ w_ih_t + h @ w_hh_t + b
        i = jax.nn.sigmoid(gates[:, 0 * H:1 * H])
        f = jax.nn.sigmoid(gates[:, 1 * H:2 * H])
        g = jnp.tanh(gates[:, 2 * H:3 * H])
        o = jax.nn.sigmoid(gates[:, 3 * H:4 * H])
        c = f * c + i * g
        h = o * jnp.tanh(c)
        return (h, c), h @ w_out_t + b_out

    B = x.shape[1]
    init = (jnp.zeros((B, H), jnp.float32), jnp.zeros((B, H), jnp.float32))
    _, ys = jax.lax.scan(step, init, x)
    return ys


def _ref_forward(params, features, captions):
    V, E = params["embedding"].shape
    embeds = jnp.take(params["embedding"], captions[:, :-1], axis=0)
    concat = jnp.concatenate([features.reshape(-1, 1, E), embeds], axis=1)
    return _ref_lstm_linear(concat.astype(jnp.float32),
                            params["w_ih_t"], params["w_hh_t"], params["b_lstm"],
                            params["w_out_t"], params["b_out"])


# -----------------------------------------------------------------------------
# Parameter init: raw weights (for the reference) + padded bf16 kernel weights.
# Padding / casting happens ONCE here, not per forward call.
# -----------------------------------------------------------------------------
def _pad_gate_cols(w, rows, H, rows_p, HW):
    """Pad (rows, 4H) gate-blocked weights/bias to (rows_p, 4HW), keeping each
    PyTorch gate block [i|f|g|o] at offset k*HW."""
    out = jnp.zeros((rows_p, 4 * HW), jnp.float32)
    for k in range(4):
        out = out.at[:rows, k * HW:k * HW + H].set(w[:, k * H:(k + 1) * H])
    return out


def init_params(key, embed_size, hidden_size, vocab_size):
    E, H, V = embed_size, hidden_size, vocab_size
    ks = jax.random.split(key, 7)
    scale = 0.1
    embedding = scale * jax.random.normal(ks[0], (V, E), jnp.float32)
    w_ih = scale * jax.random.normal(ks[1], (4 * H, E), jnp.float32)
    w_hh = scale * jax.random.normal(ks[2], (4 * H, H), jnp.float32)
    b_ih = scale * jax.random.normal(ks[3], (4 * H,), jnp.float32)
    b_hh = scale * jax.random.normal(ks[4], (4 * H,), jnp.float32)
    w_lin = scale * jax.random.normal(ks[5], (V, H), jnp.float32)
    b_lin = scale * jax.random.normal(ks[6], (V,), jnp.float32)

    w_ih_t, w_hh_t = w_ih.T, w_hh.T                 # (E, 4H), (H, 4H)
    b_lstm = (b_ih + b_hh).reshape(1, -1)           # (1, 4H)
    w_out_t = w_lin.T                               # (H, V)
    b_out = b_lin.reshape(1, -1)                    # (1, V)

    # Compact per-gate width for small hidden sizes (H<128): avoids inflating
    # the recurrent matmul / EUP work 4-16x.  For H>=128 use tile-aligned 128.
    HW = _round_up(H, 32) if H < 128 else _round_up(H, 128)
    Ec = _round_up(E, 128)
    Vp = _round_up(V, 128)

    return {
        # raw weights (pure-JAX reference only)
        "embedding": embedding,
        "w_ih_t": w_ih_t, "w_hh_t": w_hh_t, "b_lstm": b_lstm,
        "w_out_t": w_out_t, "b_out": b_out,
        # pre-padded / bf16 kernel weights (biases stay f32)
        "w_ih_p": _pad_gate_cols(w_ih_t, E, H, Ec, HW).astype(jnp.bfloat16),
        "w_hh_p": _pad_gate_cols(w_hh_t, H, H, HW, HW).astype(jnp.bfloat16),
        "b_p": _pad_gate_cols(b_lstm, 1, H, 1, HW),
        "w_out_p": jnp.zeros((HW, Vp), jnp.float32).at[:H, :V].set(w_out_t)
                      .astype(jnp.bfloat16),
        "b_out_p": jnp.zeros((1, Vp), jnp.float32).at[:, :V].set(b_out),
    }


if __name__ == "__main__":
    key = jax.random.PRNGKey(0)

    def _check(embed_size, hidden_size, vocab_size, batch, seq_len, k):
        k_p, k_f, k_c = jax.random.split(k, 3)
        params = init_params(k_p, embed_size, hidden_size, vocab_size)
        features = jax.random.normal(k_f, (batch, embed_size), jnp.float32)
        captions = jax.random.randint(k_c, (batch, seq_len), 0, vocab_size, jnp.int32)

        out = jax.block_until_ready(decoder_rnn_forward(params, features, captions))
        ref = _ref_forward(params, features, captions)

        assert out.shape == (batch, seq_len, vocab_size), out.shape
        err = float(jnp.max(jnp.abs(out - ref)))
        tol = 3e-2 * (1.0 + float(jnp.max(jnp.abs(ref))))   # bf16-operand tolerance
        assert err < tol, (err, tol)

    k1, k2 = jax.random.split(key)
    _check(32, 32, 64, 2, 8, k1)        # compact gate path (H < 128)
    _check(64, 128, 256, 3, 5, k2)      # tile-aligned gate path (H >= 128)

    print("KERNEL_OK")
</pallas_src>

<mosaic_0001>
module attributes {stable_mosaic.version = 11 : i64} {
  func.func @_lstm_recurrence_kernel(%arg0: memref<16x128xbf16, #tpu.memory_space<vmem>>, %arg1: memref<128x128xbf16, #tpu.memory_space<vmem>>, %arg2: memref<1x128xf32, #tpu.memory_space<vmem>>, %arg3: memref<32x128xbf16, #tpu.memory_space<vmem>>, %arg4: memref<16x32xf32, #tpu.memory_space<vmem>>, %arg5: memref<16x128xf32, #tpu.memory_space<vmem>>) attributes {dimension_semantics = [], scalar_prefetch = 0 : i64, scratch_operands = 1 : i64, tpu.core_type = #tpu.core_type<tc>} {
    %c0 = arith.constant 0 : index
    %c0_0 = arith.constant 0 : index
    %0 = vector.load %arg0[%c0, %c0_0] : memref<16x128xbf16, #tpu.memory_space<vmem>>, vector<16x128xbf16>
    %c0_1 = arith.constant 0 : index
    %c0_2 = arith.constant 0 : index
    %1 = vector.load %arg1[%c0_1, %c0_2] : memref<128x128xbf16, #tpu.memory_space<vmem>>, vector<128x128xbf16>
    %cst = arith.constant dense<0.000000e+00> : vector<16x128xf32>
    %2 = tpu.matmul %0, %1, %cst {dimension_numbers = #tpu.dot_dimension_numbers<[1], [0], [0], [1], [0, 0, 1, 1], [], []>} : vector<16x128xbf16>, vector<128x128xbf16>, vector<16x128xf32> -> vector<16x128xf32>
    %c0_3 = arith.constant 0 : index
    %c0_4 = arith.constant 0 : index
    %3 = vector.load %arg2[%c0_3, %c0_4] : memref<1x128xf32, #tpu.memory_space<vmem>>, vector<1x128xf32>
    %4 = vector.broadcast %3 : vector<1x128xf32> to vector<16x128xf32>
    %5 = arith.addf %2, %4 : vector<16x128xf32>
    %c0_5 = arith.constant 0 : index
    %c0_6 = arith.constant 0 : index
    %6 = vector.load %arg5[%c0_5, %c0_6] : memref<16x128xf32, #tpu.memory_space<vmem>>, vector<16x128xf32>
    tpu.vector_store %arg5[%c0_5, %c0_6], %5 {strides = array<i32>} : memref<16x128xf32, #tpu.memory_space<vmem>>, vector<16x128xf32>,
    %7 = tpu.iota {dimensions = array<i32: 1>} : vector<8x128xi32>
    %c64_i32 = arith.constant 64 : i32
    %8 = vector.broadcast %c64_i32 : i32 to vector<8x128xi32>
    %9 = arith.cmpi sge, %7, %8 : vector<8x128xi32>
    %c96_i32 = arith.constant 96 : i32
    %10 = vector.broadcast %c96_i32 : i32 to vector<8x128xi32>
    %11 = arith.cmpi slt, %7, %10 : vector<8x128xi32>
    %12 = arith.andi %9, %11 : vector<8x128xi1>
    %cst_7 = arith.constant 0.000000e+00 : f32
    %13 = vector.broadcast %cst_7 : f32 to vector<8x32xf32>
    %cst_8 = arith.constant 0.000000e+00 : f32
    %14 = vector.broadcast %cst_8 : f32 to vector<8x32xf32>
    %c0_i32 = arith.constant 0 : i32
    %c8_i32 = arith.constant 8 : i32
    %15 = arith.muli %c0_i32, %c8_i32 : i32
    %16 = tpu.assume_multiple %15, 8 : i32
    %17 = arith.index_cast %16 : i32 to index
    %c0_9 = arith.constant 0 : index
    %18 = vector.load %arg5[%17, %c0_9] : memref<16x128xf32, #tpu.memory_space<vmem>>, vector<8x128xf32>
    %19 = arith.truncf %13 : vector<8x32xf32> to vector<8x32xbf16>
    %c0_10 = arith.constant 0 : index
    %c0_11 = arith.constant 0 : index
    %20 = vector.load %arg3[%c0_10, %c0_11] : memref<32x128xbf16, #tpu.memory_space<vmem>>, vector<32x128xbf16>
    %cst_12 = arith.constant dense<0.000000e+00> : vector<8x128xf32>
    %21 = tpu.matmul %19, %20, %cst_12 {dimension_numbers = #tpu.dot_dimension_numbers<[1], [0], [0], [1], [0, 0, 1, 1], [], []>} : vector<8x32xbf16>, vector<32x128xbf16>, vector<8x128xf32> -> vector<8x128xf32>
    %22 = arith.addf %18, %21 : vector<8x128xf32>
    %23 = math.tanh %22 : vector<8x128xf32>
    %24 = arith.negf %22 : vector<8x128xf32>
    %25 = math.exp %24 : vector<8x128xf32>
    %cst_13 = arith.constant 1.000000e+00 : f32
    %26 = vector.broadcast %cst_13 : f32 to vector<8x128xf32>
    %27 = arith.addf %26, %25 : vector<8x128xf32>
    %28 = arith.divf %26, %27 : vector<8x128xf32>
    %29 = arith.select %12, %23, %28 : vector<8x128xi1>, vector<8x128xf32>
    %30 = vector.extract_strided_slice %29 {offsets = [0, 0], sizes = [8, 32], strides = [1, 1]} : vector<8x128xf32> to vector<8x32xf32>
    %31 = vector.extract_strided_slice %29 {offsets = [0, 32], sizes = [8, 32], strides = [1, 1]} : vector<8x128xf32> to vector<8x32xf32>
    %32 = vector.extract_strided_slice %29 {offsets = [0, 64], sizes = [8, 32], strides = [1, 1]} : vector<8x128xf32> to vector<8x32xf32>
    %33 = vector.extract_strided_slice %29 {offsets = [0, 96], sizes = [8, 32], strides = [1, 1]} : vector<8x128xf32> to vector<8x32xf32>
    %34 = arith.mulf %31, %14 : vector<8x32xf32>
    %35 = arith.mulf %30, %32 : vector<8x32xf32>
    %36 = arith.addf %34, %35 : vector<8x32xf32>
    %37 = math.tanh %36 : vector<8x32xf32>
    %38 = arith.mulf %33, %37 : vector<8x32xf32>
    %39 = arith.index_cast %16 : i32 to index
    %c0_14 = arith.constant 0 : index
    %40 = vector.load %arg4[%39, %c0_14] : memref<16x32xf32, #tpu.memory_space<vmem>>, vector<8x32xf32>
    tpu.vector_store %arg4[%39, %c0_14], %38 {strides = array<i32>} : memref<16x32xf32, #tpu.memory_space<vmem>>, vector<8x32xf32>,
    %c1_i32 = arith.constant 1 : i32
    %c8_i32_15 = arith.constant 8 : i32
    %41 = arith.muli %c1_i32, %c8_i32_15 : i32
    %42 = tpu.assume_multiple %41, 8 : i32
    %43 = arith.index_cast %42 : i32 to index
    %c0_16 = arith.constant 0 : index
    %44 = vector.load %arg5[%43, %c0_16] : memref<16x128xf32, #tpu.memory_space<vmem>>, vector<8x128xf32>
    %45 = arith.truncf %38 : vector<8x32xf32> to vector<8x32xbf16>
    %c0_17 = arith.constant 0 : index
    %c0_18 = arith.constant 0 : index
    %46 = vector.load %arg3[%c0_17, %c0_18] : memref<32x128xbf16, #tpu.memory_space<vmem>>, vector<32x128xbf16>
    %cst_19 = arith.constant dense<0.000000e+00> : vector<8x128xf32>
    %47 = tpu.matmul %45, %46, %cst_19 {dimension_numbers = #tpu.dot_dimension_numbers<[1], [0], [0], [1], [0, 0, 1, 1], [], []>} : vector<8x32xbf16>, vector<32x128xbf16>, vector<8x128xf32> -> vector<8x128xf32>
    %48 = arith.addf %44, %47 : vector<8x128xf32>
    %49 = math.tanh %48 : vector<8x128xf32>
    %50 = arith.negf %48 : vector<8x128xf32>
    %51 = math.exp %50 : vector<8x128xf32>
    %cst_20 = arith.constant 1.000000e+00 : f32
    %52 = vector.broadcast %cst_20 : f32 to vector<8x128xf32>
    %53 = arith.addf %52, %51 : vector<8x128xf32>
    %54 = arith.divf %52, %53 : vector<8x128xf32>
    %55 = arith.select %12, %49, %54 : vector<8x128xi1>, vector<8x128xf32>
    %56 = vector.extract_strided_slice %55 {offsets = [0, 0], sizes = [8, 32], strides = [1, 1]} : vector<8x128xf32> to vector<8x32xf32>
    %57 = vector.extract_strided_slice %55 {offsets = [0, 32], sizes = [8, 32], strides = [1, 1]} : vector<8x128xf32> to vector<8x32xf32>
    %58 = vector.extract_strided_slice %55 {offsets = [0, 64], sizes = [8, 32], strides = [1, 1]} : vector<8x128xf32> to vector<8x32xf32>
    %59 = vector.extract_strided_slice %55 {offsets = [0, 96], sizes = [8, 32], strides = [1, 1]} : vector<8x128xf32> to vector<8x32xf32>
    %60 = arith.mulf %57, %36 : vector<8x32xf32>
    %61 = arith.mulf %56, %58 : vector<8x32xf32>
    %62 = arith.addf %60, %61 : vector<8x32xf32>
    %63 = math.tanh %62 : vector<8x32xf32>
    %64 = arith.mulf %59, %63 : vector<8x32xf32>
    %65 = arith.index_cast %42 : i32 to index
    %c0_21 = arith.constant 0 : index
    %66 = vector.load %arg4[%65, %c0_21] : memref<16x32xf32, #tpu.memory_space<vmem>>, vector<8x32xf32>
    tpu.vector_store %arg4[%65, %c0_21], %64 {strides = array<i32>} : memref<16x32xf32, #tpu.memory_space<vmem>>, vector<8x32xf32>,
    %c2_i32 = arith.constant 2 : i32
    return
  }
}

module attributes {stable_mosaic.version = 11 : i64} {
  func.func @_output_proj_kernel(%arg0: i32, %arg1: memref<16x32xf32, #tpu.memory_space<vmem>>, %arg2: memref<32x128xbf16, #tpu.memory_space<vmem>>, %arg3: memref<1x128xf32, #tpu.memory_space<vmem>>, %arg4: memref<16x128xf32, #tpu.memory_space<vmem>>) attributes {dimension_semantics = [#tpu.dimension_semantics<parallel>], iteration_bounds = array<i64: 1>, scalar_prefetch = 0 : i64, scratch_operands = 0 : i64, tpu.core_type = #tpu.core_type<tc>, window_params = [{pipeline_mode = #tpu.pipeline_mode<synchronous>, transform_indices = @transform_0, window_bounds = array<i64: 16, 32>}, {transform_indices = @transform_1, window_bounds = array<i64: 32, 128>}, {transform_indices = @transform_2, window_bounds = array<i64: 1, 128>}, {transform_indices = @transform_3, window_bounds = array<i64: 16, 128>}]} {
    %c0 = arith.constant 0 : index
    %c0_0 = arith.constant 0 : index
    %0 = vector.load %arg1[%c0, %c0_0] : memref<16x32xf32, #tpu.memory_space<vmem>>, vector<16x32xf32>
    %1 = arith.truncf %0 : vector<16x32xf32> to vector<16x32xbf16>
    %c0_1 = arith.constant 0 : index
    %c0_2 = arith.constant 0 : index
    %2 = vector.load %arg2[%c0_1, %c0_2] : memref<32x128xbf16, #tpu.memory_space<vmem>>, vector<32x128xbf16>
    %cst = arith.constant dense<0.000000e+00> : vector<16x128xf32>
    %3 = tpu.matmul %1, %2, %cst {dimension_numbers = #tpu.dot_dimension_numbers<[1], [0], [0], [1], [0, 0, 1, 1], [], []>} : vector<16x32xbf16>, vector<32x128xbf16>, vector<16x128xf32> -> vector<16x128xf32>
    %c0_3 = arith.constant 0 : index
    %c0_4 = arith.constant 0 : index
    %4 = vector.load %arg3[%c0_3, %c0_4] : memref<1x128xf32, #tpu.memory_space<vmem>>, vector<1x128xf32>
    %5 = vector.broadcast %4 : vector<1x128xf32> to vector<16x128xf32>
    %6 = arith.addf %3, %5 : vector<16x128xf32>
    %c0_5 = arith.constant 0 : index
    %c0_6 = arith.constant 0 : index
    %7 = vector.load %arg4[%c0_5, %c0_6] : memref<16x128xf32, #tpu.memory_space<vmem>>, vector<16x128xf32>
    tpu.vector_store %arg4[%c0_5, %c0_6], %6 {strides = array<i32>} : memref<16x128xf32, #tpu.memory_space<vmem>>, vector<16x128xf32>,
    return
  }
  func.func @transform_0(%arg0: i32) -> (i32, i32) {
    %c0_i32 = arith.constant 0 : i32
    %c0_i32_0 = arith.constant 0 : i32
    %c0_i32_1 = arith.constant 0 : i32
    return %c0_i32, %c0_i32_0 : i32, i32
  }
  func.func @transform_1(%arg0: i32) -> (i32, i32) {
    %c0_i32 = arith.constant 0 : i32
    %c0_i32_0 = arith.constant 0 : i32
    return %c0_i32, %arg0 : i32, i32
  }
  func.func @transform_2(%arg0: i32) -> (i32, i32) {
    %c0_i32 = arith.constant 0 : i32
    %c0_i32_0 = arith.constant 0 : i32
    return %c0_i32, %arg0 : i32, i32
  }
  func.func @transform_3(%arg0: i32) -> (i32, i32) {
    %c0_i32 = arith.constant 0 : i32
    %c0_i32_0 = arith.constant 0 : i32
    return %c0_i32, %arg0 : i32, i32
  }
}

</mosaic_0001>

<bundles_post_ra>
// kernel: decoder_rnn_forward.3
= control target key start
LH: loop header
LB: loop body
LE: loop exit
PB: predicated region body
PF: predicated region fallthrough
CT: control target
= control target key end

     0   :  { %v151_v1 = vmov 0.0   ;;  %vm152_vm0 = vmmov 0   ;;  %s203_s0 = inlined_call_operand.vmem [shape: f32[16,32], index: 0, kind: input, shape index: {}]   ;;  %s204_s1 = inlined_call_operand.vmem [shape: bf16[32,128], index: 1, kind: input, shape index: {}]   ;;  %s205_s2 = inlined_call_operand.vmem [shape: f32[1,128], index: 2, kind: input, shape index: {}]   ;;  %s206_s3 = inlined_call_operand.hbm [shape: f32[16,128], index: 3, kind: output, shape index: {}]  }
   0x1   :  { %v125_v0 = vld [vmem:[%s204_s1] sm:$0xff]   ;;  %112 = vmatprep.subr.bf16.mxu0 %v151_v1  ;;  %v126_v2 = vld [vmem:[%s204_s1 + $0x8] sm:$0xff]   ;;  %116 = vmatprep.mubr.msk.bf16.mxu0 %vm152_vm0, %v151_v1 }
   0x2   :  { %113 = vmatpush3.bf16.msra.mxu0 %v125_v0  ;;  %v16_v3 = vld [vmem:[%s203_s0] sm:$0xff]  ;;  %v17_v4 = vld [vmem:[%s203_s0 + $0x8] sm:$0xff] }
   0x3   :  { %114 = vmatprep.subr.bf16.mxu0 %v151_v1 }
   0x4   :  { %8 = vsyncpa [#allocation3], 0  ;;  %v18_v5 = vpack.c.bf16 %v17_v4, %v16_v3  ;;  %vm42_vm1 = vcmask 261120   ;;  %v105_v6 = vld [vmem:[%s205_s2] ss:$0 sm:$0xff]  ;;  %s153_s1 = smov [#allocation2]  }
   0x5   :  { %s94_s22 = sshll.u32 %s153_s1, 4  ;;  %s95_s22 = int_to_ptr.vmem [resolvable:$true] %s94_s22 }
   0x6   :  { %115 = vmatpush3.bf16.msra.mxu0 %v126_v2  ;;  %s127_s0 = scalar_lea.vmem %s95_s22, 256  ;;  %p132_p1 = scmp.lt.s32.totalorder %s95_s22, %s95_s22 }
   0x7   :  { %p128_p0 = scmp.ne.s32.totalorder %s95_s22, %s127_s0  ;;  %p133_p2 = scmp.lt.s32.totalorder %s127_s0, %s127_s0 }
   0x9   :  { %117 = vmatmul.mubr.msk.bf16.vlgmr.msra.gmra.mrb[0].mxu0 %vm42_vm1, %v18_v5  ;;  %p134_p3 = por %p133_p2, %p132_p1 }
   0xb   :  { %p135_p4 = pnand %p134_p3, %p128_p0 }
  0xdc   :  { %v80_v7 = vpop.f32.mrb[0].mxu0 }
  0xdd   :  { %v81_v8 = vadd.f32 %v105_v6, %v80_v7  ;;  %v118_v9 = vpop.f32.mrb[1].mxu0 }
  0xde   :  { %v83_v10 = vpop.f32.mrb[2].mxu0 }
  0xdf   :  { %87 = vst [vmem:[#allocation2] sm:$0xff] %v81_v8  ;;  %v84_v11 = vadd.f32 %v105_v6, %v83_v10  ;;  %v119_v12 = vpop.f32.mrb[3].mxu0 }
  0xe1   :  { %88 = vst [vmem:[#allocation2 + $0x8] sm:$0xff] %v84_v11 }
  0xe2   :  { %138 = shalt.err (!%p135_p4)
}
  0xe3   :  { %s139_s24 = scalar_lea.hbm %s206_s3, 256 }
  0xe4   :  { %p140_p5 = scmp.ne.s32.totalorder %s206_s3, %s139_s24  ;;  %p143_p6 = scmp.lt.u32.totalorder %s139_s24, %s206_s3 }
  0xe6   :  { %p145_p7 = pnand %p143_p6, %p140_p5 }
  0xe8   :  { %148 = shalt.err (!%p145_p7)
}
  0xe9   :  { %s154_s29 = smov 128   ;;  %s155_s30 = smov 8  }
  0xea   :  { %100 = dma.vmem_to_hbm [thread:$0]  %s95_s22, 256, %s206_s3, [#allocation3], %s154_s29, %s154_s29, %s155_s30  }
  0xeb   :  { %149 = dma.done.wait [#allocation3], 256  }
  0xec   :  { %150 = vsyncadd [#allocation3], 4294967040 }
  0xed   :  { %104 = vsyncpa [#allocation3], 1 }

// kernel: decoder_rnn_forward.2
= control target key start
LH: loop header
LB: loop body
LE: loop exit
PB: predicated region body
PF: predicated region fallthrough
CT: control target
= control target key end

     0   :  { %v441_v0 = vmov 0.0   ;;  %vm442_vm0 = vmmov 0   ;;  %v443_v8 = vmov 0   ;;  %v140_v27 = vlaneseq  ;;  %s557_s1 = inlined_call_operand.vmem [shape: bf16[128,128], index: 1, kind: input, shape index: {}]   ;;  %s558_s3 = inlined_call_operand.vmem [shape: bf16[32,128], index: 3, kind: input, shape index: {}]   ;;  %s559_s0 = inlined_call_operand.vmem [shape: bf16[16,128], index: 0, kind: input, shape index: {}]   ;;  %s560_s2 = inlined_call_operand.vmem [shape: f32[1,128], index: 2, kind: input, shape index: {}]   ;;  %s561_s4 = inlined_call_operand.vmem [shape: f32[16,32], index: 4, kind: output, shape index: {}]  }
   0x1   :  { %371 = vmatprep.subr.bf16.mxu0 %v441_v0  ;;  %v412_v1 = vld [vmem:[%s557_s1] sm:$0xff]   ;;  %391 = vmatprep.subr.bf16.mxu1 %v441_v0  ;;  %v413_v2 = vld [vmem:[%s557_s1 + $0x8] sm:$0xff]   ;;  %v414_v3 = vld [vmem:[%s557_s1 + $0x10] sm:$0xff]   ;;  %vm162_vm4 = vcmask 261120  }
   0x2   :  { %395 = vmatprep.mubr.msk.bf16.mxu1 %vm442_vm0, %v441_v0  ;;  %387 = vmatprep.mubr.msk.bf16.mxu0 %vm442_vm0, %v441_v0  ;;  %v418_v4 = vld [vmem:[%s558_s3] sm:$0xff]   ;;  %v420_v5 = vld [vmem:[%s558_s3 + $0x8] sm:$0xff]   ;;  %v415_v6 = vld [vmem:[%s557_s1 + $0x18] sm:$0xff]   ;;  %v141_v29 = vand.u32 127, %v140_v27 }
   0x3   :  { %372 = vmatpush3.bf16.msra.mxu0 %v412_v1  ;;  %392 = vmatpush3.bf16.msra.mxu1 %v418_v4  ;;  %v416_v7 = vld [vmem:[%s557_s1 + $0x20] sm:$0xff]   ;;  %v417_v9 = vld [vmem:[%s557_s1 + $0x28] sm:$0xff]   ;;  %v419_v10 = vld [vmem:[%s557_s1 + $0x30] sm:$0xff]  }
   0x4   :  { %373 = vmatprep.subr.bf16.mxu0 %v441_v0  ;;  %393 = vmatprep.subr.bf16.mxu1 %v441_v0  ;;  %v421_v11 = vld [vmem:[%s557_s1 + $0x38] sm:$0xff]   ;;  %v422_v12 = vld [vmem:[%s559_s0] sm:$0xff]   ;;  %vm142_vm1 = vcmp.ge.s32.totalorder %v141_v29, 64  ;;  %vm143_vm2 = vcmp.lt.s32.totalorder %v141_v29, 96  ;;  %s444_s0 = smov 64   ;;  %s445_s1 = smov 32  }
   0x5   :  { %v338_v17 = vld [vmem:[%s560_s2] ss:$0 sm:$0xff]  ;;  %vm524_vm3 = vmand %vm142_vm1, %vm143_vm2  ;;  %v424_v40 = vld [vmem:[%s558_s3 + $0x8] sm:$0xff]  }
   0x6   :  { %v423_v39 = vld [vmem:[%s558_s3] sm:$0xff]  }
   0x7   :  { %374 = vmatpush3.bf16.msra.mxu0 %v413_v2  ;;  %394 = vmatpush3.bf16.msra.mxu1 %v420_v5 }
   0x8   :  { %375 = vmatprep.subr.bf16.mxu0 %v441_v0  ;;  %399 = vmatprep.subr.bf16.mxu1 %v441_v0 }
   0xa   :  { %396 = vmatmul.mubr.bf16.vlgmr.msra.gmra.mrb[0].mxu1 %v443_v8 }
   0xb   :  { %376 = vmatpush3.bf16.msra.mxu0 %v414_v3  ;;  %403 = vmatprep.mubr.msk.bf16.mxu1 %vm442_vm0, %v441_v0 }
   0xc   :  { %377 = vmatprep.subr.bf16.mxu0 %v441_v0  ;;  %400 = vmatpush3.bf16.msra.mxu1 %v423_v39 }
   0xd   :  { %401 = vmatprep.subr.bf16.mxu1 %v441_v0 }
   0xf   :  { %378 = vmatpush3.bf16.msra.mxu0 %v415_v6 }
  0x10   :  { %379 = vmatprep.subr.bf16.mxu0 %v441_v0  ;;  %402 = vmatpush3.bf16.msra.mxu1 %v424_v40 }
  0x13   :  { %380 = vmatpush3.bf16.msra.mxu0 %v416_v7 }
  0x14   :  { %381 = vmatprep.subr.bf16.mxu0 %v441_v0 }
  0x17   :  { %382 = vmatpush3.bf16.msra.mxu0 %v417_v9 }
  0x18   :  { %383 = vmatprep.subr.bf16.mxu0 %v441_v0 }
  0x1b   :  { %384 = vmatpush3.bf16.msra.mxu0 %v419_v10 }
  0x1c   :  { %385 = vmatprep.subr.bf16.mxu0 %v441_v0 }
  0x1f   :  { %386 = vmatpush3.bf16.msra.mxu0 %v421_v11 }
  0x22   :  { %388 = vmatmul.mubr.bf16.vlgmr.msra.gmra.mrb[0].mxu0 %v422_v12 }
  0xdd   :  { %v200_v13 = vpop.f32.mrb[0].mxu1 }
  0xde   :  { %v397_v14 = vpop.f32.mrb[1].mxu1 }
  0xdf   :  { %v203_v15 = vpop.f32.mrb[2].mxu1 }
  0xe0   :  { %v398_v16 = vpop.f32.mrb[3].mxu1 }
  0xf5   :  { %v131_v18 = vpop.f32.mrb[0].mxu0 }
  0xf6   :  { %v132_v19 = vadd.f32 %v338_v17, %v131_v18  ;;  %v389_v20 = vpop.f32.mrb[1].mxu0 }
  0xf7   :  { %v134_v21 = vpop.f32.mrb[2].mxu0 }
  0xf8   :  { %v206_v22 = vadd.f32 %v200_v13, %v132_v19  ;;  %v135_v23 = vadd.f32 %v338_v17, %v134_v21  ;;  %v390_v24 = vpop.f32.mrb[3].mxu0 }
  0xfa   :  { %v350_v25 = vmul.f32 -1.442695, %v206_v22 }
  0xfc   :  { %425 = vpow2.f32 %v350_v25 }
  0xfd   :  { %427 = vtanh.f32 %v206_v22 }
 0x106   :  { %v426_v26 = vpop.eup %425 }
 0x107   :  { %v211_v28 = vadd.f32 1.0, %v426_v26  ;;  %v428_v31 = vpop.eup %427 }
 0x109   :  { %429 = vrcp.f32 %v211_v28 }
 0x113   :  { %v430_v32 = vpop.eup %429 }
 0x114   :  { %v214_v33 = vsel %vm524_vm3, %v428_v31, %v430_v32 }
 0x115   :  { %217 = vrot.lane.b32.xlu0 %v214_v33, %s444_s0  ;;  %v215_v36 = vmul.f32 0.0, %v214_v33 }
 0x187   :  { %v218_v34 = vpop.permute.xlu0 %217 }
 0x188   :  { %v220_v35 = vmul.f32 %v218_v34, %v214_v33 }
 0x18a   :  { %222 = vrot.lane.b32.xlu0 %v220_v35, %s445_s1 }
 0x1fc   :  { %v223_v37 = vpop.permute.xlu0 %222 }
 0x1fd   :  { %v225_v38 = vadd.f32 %v223_v37, %v215_v36 }
 0x1ff   :  { %431 = vtanh.f32 %v225_v38 }
 0x209   :  { %v432_v41 = vpop.eup %431 }
 0x20a   :  { %228 = vrot.lane.b32.xlu1 %v432_v41, %s444_s0 }
 0x27c   :  { %v229_v42 = vpop.permute.xlu1 %228 }
 0x27d   :  { %v231_v43 = vmul.f32 %v229_v42, %v214_v33 }
 0x27f   :  { %v239_v44 = vpack.c.bf16 %v231_v43, %v231_v43 }
 0x281   :  { %245 = vrot.lane.b32.xlu1 %v239_v44, %s445_s1 }
 0x2f3   :  { %v246_v45 = vpop.permute.xlu1 %245 }
 0x2f4   :  { %404 = vmatmul.mubr.msk.bf16.vlgmr.msra.gmra.mrb[4].mxu1 %vm162_vm4, %v246_v45 }
 0x3c7   :  { %v296_v46 = vpop.f32.mrb[4].mxu1 }
 0x3c8   :  { %v302_v47 = vadd.f32 %v296_v46, %v135_v23  ;;  %v405_v48 = vpop.f32.mrb[5].mxu1 }
 0x3c9   :  { %v299_v49 = vpop.f32.mrb[6].mxu1 }
 0x3ca   :  { %v354_v50 = vmul.f32 -1.442695, %v302_v47  ;;  %v406_v51 = vpop.f32.mrb[7].mxu1 }
 0x3cc   :  { %433 = vpow2.f32 %v354_v50 }
 0x3cd   :  { %435 = vtanh.f32 %v302_v47 }
 0x3d6   :  { %v434_v52 = vpop.eup %433 }
 0x3d7   :  { %v307_v53 = vadd.f32 1.0, %v434_v52  ;;  %v436_v54 = vpop.eup %435 }
 0x3d9   :  { %437 = vrcp.f32 %v307_v53 }
 0x3e3   :  { %v438_v55 = vpop.eup %437 }
 0x3e4   :  { %v310_v56 = vsel %vm524_vm3, %v436_v54, %v438_v55 }
 0x3e5   :  { %313 = vrot.lane.b32.xlu0 %v310_v56, %s444_s0  ;;  %v311_v59 = vmul.f32 %v310_v56, %v225_v38 }
 0x457   :  { %v314_v57 = vpop.permute.xlu0 %313 }
 0x458   :  { %v316_v58 = vmul.f32 %v314_v57, %v310_v56 }
 0x45a   :  { %318 = vrot.lane.b32.xlu1 %v316_v58, %s445_s1 }
 0x45e   :  { %233 = vrot.lane.b32.xlu1 %v231_v43, %s445_s1 }
 0x4cc   :  { %v319_v60 = vpop.permute.xlu1 %318 }
 0x4cd   :  { %v321_v61 = vadd.f32 %v319_v60, %v311_v59 }
 0x4cf   :  { %439 = vtanh.f32 %v321_v61 }
 0x4d0   :  { %v234_v62 = vpop.permute.xlu1 %233 }
 0x4d1   :  { %236 = vst.msk [vmem:[%s561_s4] sm:$0xff] %vm162_vm4, %v234_v62 }
 0x4d9   :  { %v440_v63 = vpop.eup %439 }
 0x4da   :  { %324 = vrot.lane.b32.xlu0 %v440_v63, %s444_s0 }
 0x54c   :  { %v325_v0 = vpop.permute.xlu0 %324 }
 0x54d   :  { %v327_v1 = vmul.f32 %v325_v0, %v310_v56 }
 0x54f   :  { %329 = vrot.lane.b32.xlu0 %v327_v1, %s445_s1 }
 0x5c1   :  { %v330_v2 = vpop.permute.xlu0 %329 }
 0x5c2   :  { %355 = vst.msk [vmem:[%s561_s4 + $0x8] sm:$0xff] %vm162_vm4, %v330_v2 }

</bundles_post_ra>
